<compile_context>
chip_gen: v6e
topology: v6e:2x2x1
jax: 0.10.0
libtpu: 0.0.40
codegen_flags: <defaults>
</compile_context>

<pallas_src>
import functools

import jax
import jax.numpy as jnp
from jax.experimental import pallas as pl
from jax.experimental.pallas import tpu as pltpu

N_EMBD = 128
HIDDEN = 4 * N_EMBD  # 512
BLOCK_SIZE = 64      # sequence length


def ffn_kernel(x_ref, w1_ref, b1_ref, w2_ref, b2_ref, o_ref, acc_ref):
    # Grid: (token tiles i, hidden-dim chunks k).
    # x_ref:  (tm, C)   bf16  -- tile of tokens (resident across k)
    # w1_ref: (C, th)   bf16  -- H-chunk of first linear weight
    # b1_ref: (1, th)   f32
    # w2_ref: (th, C)   bf16  -- H-chunk of second linear weight
    # b2_ref: (1, C)    f32
    # o_ref:  (tm, C)         -- output tile (resident across k)
    # acc_ref:(tm, C)   f32   -- VMEM accumulator for the second matmul
    k = pl.program_id(1)

    @pl.when(k == 0)
    def _():
        acc_ref[...] = jnp.zeros_like(acc_ref)

    # Linear 1 chunk + bias + ReLU: bf16 operands on the MXU, f32 accumulate,
    # elementwise math kept in f32.
    h = jnp.dot(x_ref[...], w1_ref[...], preferred_element_type=jnp.float32)
    h = jnp.maximum(h + b1_ref[...], 0.0)

    # Linear 2 partial product over this H-chunk, accumulated in f32.
    acc_ref[...] += jnp.dot(h.astype(w2_ref.dtype), w2_ref[...],
                            preferred_element_type=jnp.float32)

    @pl.when(k == pl.num_programs(1) - 1)
    def _():
        # Dropout: identity in eval mode.
        o_ref[...] = (acc_ref[...] + b2_ref[...]).astype(o_ref.dtype)


@functools.partial(jax.jit, static_argnames=("tm", "th"))
def feed_forward(x, w1, b1, w2, b2, *, tm=128, th=None):
    """x: (B, T, C) float32 -> (B, T, C) float32."""
    B, T, C = x.shape
    H = w1.shape[1]
    M = B * T

    if th is None:
        th = H if H <= 512 else 512
    assert H % th == 0, "hidden dim must be divisible by the H-chunk size"
    assert tm % 8 == 0, "token tile must be a multiple of 8 sublanes"

    # Pad the token axis so every tile is full (keeps stores lane-dense).
    n_tm = pl.cdiv(M, tm)
    M_pad = n_tm * tm

    x2d = x.reshape(M, C)
    if M_pad != M:
        x2d = jnp.pad(x2d, ((0, M_pad - M), (0, 0)))

    # bf16 matmul operands (halves weight/activation DMA bytes too);
    # biases stay f32 and are added after the f32-accumulated dots.
    x_bf = x2d.astype(jnp.bfloat16)
    w1_bf = w1.astype(jnp.bfloat16)
    w2_bf = w2.astype(jnp.bfloat16)
    b1_2d = b1.reshape(1, H).astype(jnp.float32)
    b2_2d = b2.reshape(1, C).astype(jnp.float32)

    out_itemsize = jnp.dtype(x.dtype).itemsize
    cost = pl.CostEstimate(
        flops=4 * M_pad * C * H,  # two (M,C,H) matmuls, 2 flops per MAC
        transcendentals=0,
        bytes_accessed=(x_bf.size * 2 + w1_bf.size * 2 + w2_bf.size * 2
                        + b1_2d.size * 4 + b2_2d.size * 4
                        + M_pad * C * out_itemsize),
    )

    out2d = pl.pallas_call(
        ffn_kernel,
        out_shape=jax.ShapeDtypeStruct((M_pad, C), x.dtype),
        grid_spec=pltpu.PrefetchScalarGridSpec(
            num_scalar_prefetch=0,
            grid=(n_tm, H // th),
            in_specs=[
                pl.BlockSpec((tm, C), lambda i, k: (i, 0)),   # x tile
                pl.BlockSpec((C, th), lambda i, k: (0, k)),   # W1 H-chunk
                pl.BlockSpec((1, th), lambda i, k: (0, k)),   # b1 H-chunk
                pl.BlockSpec((th, C), lambda i, k: (k, 0)),   # W2 H-chunk
                pl.BlockSpec((1, C), lambda i, k: (0, 0)),    # b2
            ],
            out_specs=pl.BlockSpec((tm, C), lambda i, k: (i, 0)),
            scratch_shapes=[pltpu.VMEM((tm, C), jnp.float32)],
        ),
        compiler_params=pltpu.CompilerParams(
            dimension_semantics=("parallel", "arbitrary"),
        ),
        cost_estimate=cost,
    )(x_bf, w1_bf, b1_2d, w2_bf, b2_2d)

    if M_pad != M:
        out2d = out2d[:M]
    return out2d.reshape(B, T, C)


def reference(x, w1, b1, w2, b2):
    h = jnp.maximum(x @ w1 + b1, 0.0)
    return h @ w2 + b2


if __name__ == "__main__":
    key = jax.random.PRNGKey(0)
    kx, k1, k2, k3, k4 = jax.random.split(key, 5)

    B, T, C = 2, BLOCK_SIZE, N_EMBD
    H = HIDDEN

    # Deterministic parameter init (PyTorch nn.Linear default:
    # U(-1/sqrt(fan_in), 1/sqrt(fan_in)))
    bound1 = 1.0 / (C ** 0.5)
    bound2 = 1.0 / (H ** 0.5)
    x = jax.random.normal(kx, (B, T, C), dtype=jnp.float32)
    w1 = jax.random.uniform(k1, (C, H), jnp.float32, -bound1, bound1)
    b1 = jax.random.uniform(k2, (H,), jnp.float32, -bound1, bound1)
    w2 = jax.random.uniform(k3, (H, C), jnp.float32, -bound2, bound2)
    b2 = jax.random.uniform(k4, (C,), jnp.float32, -bound2, bound2)

    y = feed_forward(x, w1, b1, w2, b2)
    jax.block_until_ready(y)

    y_ref = reference(x, w1, b1, w2, b2)
    assert y.shape == (B, T, C)
    # bf16 matmul operands (f32 accumulation) -> looser tolerance than pure f32.
    assert jnp.allclose(y, y_ref, atol=3e-2, rtol=3e-2), "mismatch vs reference"

    print("KERNEL_OK")
</pallas_src>

<mosaic_0001>
module attributes {stable_mosaic.version = 11 : i64} {
  func.func @ffn_kernel(%arg0: i32, %arg1: i32, %arg2: memref<128x128xbf16, #tpu.memory_space<vmem>>, %arg3: memref<128x512xbf16, #tpu.memory_space<vmem>>, %arg4: memref<1x512xf32, #tpu.memory_space<vmem>>, %arg5: memref<512x128xbf16, #tpu.memory_space<vmem>>, %arg6: memref<1x128xf32, #tpu.memory_space<vmem>>, %arg7: memref<128x128xf32, #tpu.memory_space<vmem>>, %arg8: memref<128x128xf32, #tpu.memory_space<vmem>>) attributes {dimension_semantics = [#tpu.dimension_semantics<parallel>, #tpu.dimension_semantics<arbitrary>], iteration_bounds = array<i64: 1, 1>, scalar_prefetch = 0 : i64, scratch_operands = 1 : i64, tpu.core_type = #tpu.core_type<tc>, window_params = [{transform_indices = @transform_0, window_bounds = array<i64: 128, 128>}, {transform_indices = @transform_1, window_bounds = array<i64: 128, 512>}, {transform_indices = @transform_2, window_bounds = array<i64: 1, 512>}, {transform_indices = @transform_3, window_bounds = array<i64: 512, 128>}, {pipeline_mode = #tpu.pipeline_mode<synchronous>, transform_indices = @transform_4, window_bounds = array<i64: 1, 128>}, {transform_indices = @transform_5, window_bounds = array<i64: 128, 128>}]} {
    %c0_i32 = arith.constant 0 : i32
    %0 = arith.cmpi eq, %arg1, %c0_i32 : i32
    %1 = arith.extui %0 : i1 to i32
    %c0_i32_0 = arith.constant 0 : i32
    %2 = arith.cmpi ne, %1, %c0_i32_0 : i32
    scf.if %2 {
      %cst_16 = arith.constant 0.000000e+00 : f32
      %20 = vector.broadcast %cst_16 : f32 to vector<128x128xf32>
      %c0_17 = arith.constant 0 : index
      %c0_18 = arith.constant 0 : index
      %21 = vector.load %arg8[%c0_17, %c0_18] : memref<128x128xf32, #tpu.memory_space<vmem>>, vector<128x128xf32>
      tpu.vector_store %arg8[%c0_17, %c0_18], %20 {strides = array<i32>} : memref<128x128xf32, #tpu.memory_space<vmem>>, vector<128x128xf32>,
    } else {
    }
    %c0 = arith.constant 0 : index
    %c0_1 = arith.constant 0 : index
    %3 = vector.load %arg2[%c0, %c0_1] : memref<128x128xbf16, #tpu.memory_space<vmem>>, vector<128x128xbf16>
    %c0_2 = arith.constant 0 : index
    %c0_3 = arith.constant 0 : index
    %4 = vector.load %arg3[%c0_2, %c0_3] : memref<128x512xbf16, #tpu.memory_space<vmem>>, vector<128x512xbf16>
    %cst = arith.constant dense<0.000000e+00> : vector<128x512xf32>
    %5 = tpu.matmul %3, %4, %cst {dimension_numbers = #tpu.dot_dimension_numbers<[1], [0], [0], [1], [0, 0, 1, 1], [], []>} : vector<128x128xbf16>, vector<128x512xbf16>, vector<128x512xf32> -> vector<128x512xf32>
    %c0_4 = arith.constant 0 : index
    %c0_5 = arith.constant 0 : index
    %6 = vector.load %arg4[%c0_4, %c0_5] : memref<1x512xf32, #tpu.memory_space<vmem>>, vector<1x512xf32>
    %7 = vector.broadcast %6 : vector<1x512xf32> to vector<128x512xf32>
    %8 = arith.addf %5, %7 : vector<128x512xf32>
    %cst_6 = arith.constant 0.000000e+00 : f32
    %9 = vector.broadcast %cst_6 : f32 to vector<128x512xf32>
    %10 = arith.maximumf %8, %9 : vector<128x512xf32>
    %c0_7 = arith.constant 0 : index
    %c0_8 = arith.constant 0 : index
    %11 = vector.load %arg8[%c0_7, %c0_8] : memref<128x128xf32, #tpu.memory_space<vmem>>, vector<128x128xf32>
    %12 = arith.truncf %10 : vector<128x512xf32> to vector<128x512xbf16>
    %c0_9 = arith.constant 0 : index
    %c0_10 = arith.constant 0 : index
    %13 = vector.load %arg5[%c0_9, %c0_10] : memref<512x128xbf16, #tpu.memory_space<vmem>>, vector<512x128xbf16>
    %cst_11 = arith.constant dense<0.000000e+00> : vector<128x128xf32>
    %14 = tpu.matmul %12, %13, %cst_11 {dimension_numbers = #tpu.dot_dimension_numbers<[1], [0], [0], [1], [0, 0, 1, 1], [], []>} : vector<128x512xbf16>, vector<512x128xbf16>, vector<128x128xf32> -> vector<128x128xf32>
    %15 = arith.addf %11, %14 : vector<128x128xf32>
    %c0_12 = arith.constant 0 : index
    %c0_13 = arith.constant 0 : index
    %16 = vector.load %arg8[%c0_12, %c0_13] : memref<128x128xf32, #tpu.memory_space<vmem>>, vector<128x128xf32>
    tpu.vector_store %arg8[%c0_12, %c0_13], %15 {strides = array<i32>} : memref<128x128xf32, #tpu.memory_space<vmem>>, vector<128x128xf32>,
    %c0_i32_14 = arith.constant 0 : i32
    %17 = arith.cmpi eq, %arg1, %c0_i32_14 : i32
    %18 = arith.extui %17 : i1 to i32
    %c0_i32_15 = arith.constant 0 : i32
    %19 = arith.cmpi ne, %18, %c0_i32_15 : i32
    scf.if %19 {
      %c0_16 = arith.constant 0 : index
      %c0_17 = arith.constant 0 : index
      %20 = vector.load %arg8[%c0_16, %c0_17] : memref<128x128xf32, #tpu.memory_space<vmem>>, vector<128x128xf32>
      %c0_18 = arith.constant 0 : index
      %c0_19 = arith.constant 0 : index
      %21 = vector.load %arg6[%c0_18, %c0_19] : memref<1x128xf32, #tpu.memory_space<vmem>>, vector<1x128xf32>
      %22 = vector.broadcast %21 : vector<1x128xf32> to vector<128x128xf32>
      %23 = arith.addf %20, %22 : vector<128x128xf32>
      %c0_20 = arith.constant 0 : index
      %c0_21 = arith.constant 0 : index
      %24 = vector.load %arg7[%c0_20, %c0_21] : memref<128x128xf32, #tpu.memory_space<vmem>>, vector<128x128xf32>
      tpu.vector_store %arg7[%c0_20, %c0_21], %23 {strides = array<i32>} : memref<128x128xf32, #tpu.memory_space<vmem>>, vector<128x128xf32>,
    } else {
    }
    return
  }
  func.func @transform_0(%arg0: i32, %arg1: i32) -> (i32, i32) {
    %c0_i32 = arith.constant 0 : i32
    %c0_i32_0 = arith.constant 0 : i32
    return %arg0, %c0_i32 : i32, i32
  }
  func.func @transform_1(%arg0: i32, %arg1: i32) -> (i32, i32) {
    %c0_i32 = arith.constant 0 : i32
    %c0_i32_0 = arith.constant 0 : i32
    return %c0_i32, %arg1 : i32, i32
  }
  func.func @transform_2(%arg0: i32, %arg1: i32) -> (i32, i32) {
    %c0_i32 = arith.constant 0 : i32
    %c0_i32_0 = arith.constant 0 : i32
    return %c0_i32, %arg1 : i32, i32
  }
  func.func @transform_3(%arg0: i32, %arg1: i32) -> (i32, i32) {
    %c0_i32 = arith.constant 0 : i32
    %c0_i32_0 = arith.constant 0 : i32
    return %arg1, %c0_i32 : i32, i32
  }
  func.func @transform_4(%arg0: i32, %arg1: i32) -> (i32, i32) {
    %c0_i32 = arith.constant 0 : i32
    %c0_i32_0 = arith.constant 0 : i32
    %c0_i32_1 = arith.constant 0 : i32
    return %c0_i32, %c0_i32_0 : i32, i32
  }
  func.func @transform_5(%arg0: i32, %arg1: i32) -> (i32, i32) {
    %c0_i32 = arith.constant 0 : i32
    %c0_i32_0 = arith.constant 0 : i32
    return %arg0, %c0_i32 : i32, i32
  }
}

</mosaic_0001>

<bundles_post_ra>
// kernel: feed_forward.1
= control target key start
LH: loop header
LB: loop body
LE: loop exit
PB: predicated region body
PF: predicated region fallthrough
CT: control target
= control target key end

     0   :  { %v1529_v2 = vmov 0   ;;  %s1894_s0 = inlined_call_operand.vmem [shape: bf16[128,128], index: 0, kind: input, shape index: {}]   ;;  %s1895_s1 = inlined_call_operand.vmem [shape: bf16[128,512], index: 1, kind: input, shape index: {}]   ;;  %s1896_s2 = inlined_call_operand.vmem [shape: f32[1,512], index: 2, kind: input, shape index: {}]   ;;  %s1897_s3 = inlined_call_operand.vmem [shape: bf16[512,128], index: 3, kind: input, shape index: {}]   ;;  %s1898_s4 = inlined_call_operand.vmem [shape: f32[1,128], index: 4, kind: input, shape index: {}]   ;;  %s1899_s5 = inlined_call_operand.hbm [shape: f32[128,128], index: 5, kind: output, shape index: {}]  }
   0x1   :  { %v1419_v0 = vld [vmem:[%s1895_s1 + $0xe4] ss:$16 sps:$4 sm:$0xff]   ;;  %v1421_v1 = vld [vmem:[%s1895_s1 + $0xec] ss:$16 sps:$4 sm:$0xff]   ;;  %352 = vmatprep.mubr.bf16.mxu0 %v1529_v2  ;;  %465 = vmatprep.mubr.bf16.mxu1 %v1529_v2  ;;  %v1423_v3 = vld [vmem:[%s1895_s1 + $0xe0] ss:$16 sps:$4 sm:$0xff]  }
   0x2   :  { %320 = vmatprep.subr.bf16.mxu0 %v1419_v0  ;;  %v1424_v4 = vld [vmem:[%s1895_s1 + $0xe8] ss:$16 sps:$4 sm:$0xff]   ;;  %433 = vmatprep.subr.bf16.mxu1 %v1421_v1  ;;  %v1425_v5 = vld [vmem:[%s1895_s1 + $0xc4] ss:$16 sps:$4 sm:$0xff]   ;;  %v1427_v6 = vld [vmem:[%s1895_s1 + $0xcc] ss:$16 sps:$4 sm:$0xff]  }
   0x3   :  { %321 = vmatpush1.bf16.msra.mxu0 %v1423_v3  ;;  %434 = vmatpush1.bf16.msra.mxu1 %v1424_v4  ;;  %v1429_v7 = vld [vmem:[%s1895_s1 + $0xc0] ss:$16 sps:$4 sm:$0xff]   ;;  %v1430_v8 = vld [vmem:[%s1895_s1 + $0xc8] ss:$16 sps:$4 sm:$0xff]   ;;  %v1431_v9 = vld [vmem:[%s1895_s1 + $0xa4] ss:$16 sps:$4 sm:$0xff]  }
   0x4   :  { %322 = vmatprep.subr.bf16.mxu0 %v1425_v5  ;;  %435 = vmatprep.subr.bf16.mxu1 %v1427_v6  ;;  %v1433_v10 = vld [vmem:[%s1895_s1 + $0xac] ss:$16 sps:$4 sm:$0xff]   ;;  %v1435_v11 = vld [vmem:[%s1895_s1 + $0xa0] ss:$16 sps:$4 sm:$0xff]   ;;  %v1436_v12 = vld [vmem:[%s1895_s1 + $0xa8] ss:$16 sps:$4 sm:$0xff]  }
   0x5   :  { %v1437_v13 = vld [vmem:[%s1895_s1 + $0x84] ss:$16 sps:$4 sm:$0xff]   ;;  %v1439_v14 = vld [vmem:[%s1895_s1 + $0x8c] ss:$16 sps:$4 sm:$0xff]   ;;  %v1441_v15 = vld [vmem:[%s1895_s1 + $0x80] ss:$16 sps:$4 sm:$0xff]  }
   0x6   :  { %v1442_v16 = vld [vmem:[%s1895_s1 + $0x88] ss:$16 sps:$4 sm:$0xff]   ;;  %v1443_v17 = vld [vmem:[%s1895_s1 + $0x64] ss:$16 sps:$4 sm:$0xff]   ;;  %v1445_v18 = vld [vmem:[%s1895_s1 + $0x6c] ss:$16 sps:$4 sm:$0xff]  }
   0x7   :  { %323 = vmatpush1.bf16.msra.mxu0 %v1429_v7  ;;  %436 = vmatpush1.bf16.msra.mxu1 %v1430_v8  ;;  %v1447_v19 = vld [vmem:[%s1895_s1 + $0x60] ss:$16 sps:$4 sm:$0xff]   ;;  %v1448_v20 = vld [vmem:[%s1895_s1 + $0x68] ss:$16 sps:$4 sm:$0xff]   ;;  %v1449_v21 = vld [vmem:[%s1895_s1 + $0x44] ss:$16 sps:$4 sm:$0xff]  }
   0x8   :  { %324 = vmatprep.subr.bf16.mxu0 %v1431_v9  ;;  %437 = vmatprep.subr.bf16.mxu1 %v1433_v10  ;;  %v1451_v22 = vld [vmem:[%s1895_s1 + $0x4c] ss:$16 sps:$4 sm:$0xff]   ;;  %v1453_v23 = vld [vmem:[%s1895_s1 + $0x40] ss:$16 sps:$4 sm:$0xff]   ;;  %v1454_v24 = vld [vmem:[%s1895_s1 + $0x48] ss:$16 sps:$4 sm:$0xff]  }
   0x9   :  { %v1455_v25 = vld [vmem:[%s1895_s1 + $0x24] ss:$16 sps:$4 sm:$0xff]   ;;  %v1457_v26 = vld [vmem:[%s1895_s1 + $0x2c] ss:$16 sps:$4 sm:$0xff]   ;;  %v1459_v27 = vld [vmem:[%s1895_s1 + $0x20] ss:$16 sps:$4 sm:$0xff]  }
   0xa   :  { %v1460_v28 = vld [vmem:[%s1895_s1 + $0x28] ss:$16 sps:$4 sm:$0xff]   ;;  %v1461_v29 = vld [vmem:[%s1895_s1 + $0x4] ss:$16 sps:$4 sm:$0xff]   ;;  %v1463_v30 = vld [vmem:[%s1895_s1 + $0xc] ss:$16 sps:$4 sm:$0xff]  }
   0xb   :  { %325 = vmatpush1.bf16.msra.mxu0 %v1435_v11  ;;  %438 = vmatpush1.bf16.msra.mxu1 %v1436_v12  ;;  %v1465_v31 = vld [vmem:[%s1895_s1] ss:$16 sps:$4 sm:$0xff]   ;;  %v1466_v32 = vld [vmem:[%s1895_s1 + $0x8] ss:$16 sps:$4 sm:$0xff]  }
   0xc   :  { %326 = vmatprep.subr.bf16.mxu0 %v1437_v13  ;;  %439 = vmatprep.subr.bf16.mxu1 %v1439_v14  ;;  %v1467_v33 = vld [vmem:[%s1894_s0] sm:$0xff]   ;;  %v1475_v34 = vld [vmem:[%s1897_s3 + $0x78] sm:$0xff]   ;;  %v1479_v38 = vld [vmem:[%s1897_s3 + $0x70] sm:$0xff]  }
   0xd   :  { %v1476_v35 = vld [vmem:[%s1897_s3 + $0xf8] sm:$0xff]   ;;  %v1480_v39 = vld [vmem:[%s1897_s3 + $0xf0] sm:$0xff]   ;;  %v1468_v41 = vld [vmem:[%s1894_s0 + $0x8] sm:$0xff]  }
   0xe   :  { %v1477_v36 = vld [vmem:[%s1897_s3 + $0x38] sm:$0xff]   ;;  %v1481_v40 = vld [vmem:[%s1897_s3 + $0x30] sm:$0xff]   ;;  %v1483_v43 = vld [vmem:[%s1897_s3 + $0x68] sm:$0xff]  }
   0xf   :  { %327 = vmatpush1.bf16.msra.mxu0 %v1441_v15  ;;  %440 = vmatpush1.bf16.msra.mxu1 %v1442_v16  ;;  %v1478_v37 = vld [vmem:[%s1897_s3 + $0xb8] sm:$0xff]   ;;  %v1482_v42 = vld [vmem:[%s1897_s3 + $0xb0] sm:$0xff]   ;;  %v1484_v44 = vld [vmem:[%s1897_s3 + $0xe8] sm:$0xff]  }
  0x10   :  { %328 = vmatprep.subr.bf16.mxu0 %v1443_v17  ;;  %441 = vmatprep.subr.bf16.mxu1 %v1445_v18  ;;  %v1485_v45 = vld [vmem:[%s1897_s3 + $0x28] sm:$0xff]   ;;  %v1487_v47 = vld [vmem:[%s1897_s3 + $0x60] sm:$0xff]   ;;  %v1469_v50 = vld [vmem:[%s1894_s0 + $0x10] sm:$0xff]  }
  0x11   :  { %v1486_v46 = vld [vmem:[%s1897_s3 + $0xa8] sm:$0xff]   ;;  %v1488_v48 = vld [vmem:[%s1897_s3 + $0xe0] sm:$0xff]   ;;  %v1491_v52 = vld [vmem:[%s1897_s3 + $0x58] sm:$0xff]  }
  0x12   :  { %v1489_v49 = vld [vmem:[%s1897_s3 + $0x20] sm:$0xff]   ;;  %v1492_v53 = vld [vmem:[%s1897_s3 + $0xd8] sm:$0xff]   ;;  %v1495_v56 = vld [vmem:[%s1897_s3 + $0x50] sm:$0xff]  }
  0x13   :  { %329 = vmatpush1.bf16.msra.mxu0 %v1447_v19  ;;  %442 = vmatpush1.bf16.msra.mxu1 %v1448_v20  ;;  %v1490_v51 = vld [vmem:[%s1897_s3 + $0xa0] sm:$0xff]   ;;  %v1493_v54 = vld [vmem:[%s1897_s3 + $0x18] sm:$0xff]   ;;  %v1496_v57 = vld [vmem:[%s1897_s3 + $0xd0] sm:$0xff]  }
  0x14   :  { %330 = vmatprep.subr.bf16.mxu0 %v1449_v21  ;;  %443 = vmatprep.subr.bf16.mxu1 %v1451_v22  ;;  %v1494_v55 = vld [vmem:[%s1897_s3 + $0x98] sm:$0xff]   ;;  %v1497_v58 = vld [vmem:[%s1897_s3 + $0x10] sm:$0xff]   ;;  %v1499_v61 = vld [vmem:[%s1897_s3 + $0x48] sm:$0xff]  }
  0x15   :  { %v1470_v59 = vld [vmem:[%s1894_s0 + $0x18] sm:$0xff]   ;;  %v1498_v60 = vld [vmem:[%s1897_s3 + $0x90] sm:$0xff]   ;;  %v1500_v62 = vld [vmem:[%s1897_s3 + $0xc8] sm:$0xff]  }
  0x16   :  { %v1501_v63 = vld [vmem:[%s1897_s3 + $0x8] sm:$0xff]  }
  0x17   :  { %331 = vmatpush1.bf16.msra.mxu0 %v1453_v23  ;;  %444 = vmatpush1.bf16.msra.mxu1 %v1454_v24  ;;  %v1502_v0 = vld [vmem:[%s1897_s3 + $0x88] sm:$0xff]  }
  0x18   :  { %332 = vmatprep.subr.bf16.mxu0 %v1455_v25  ;;  %445 = vmatprep.subr.bf16.mxu1 %v1457_v26 }
  0x1b   :  { %333 = vmatpush1.bf16.msra.mxu0 %v1459_v27  ;;  %446 = vmatpush1.bf16.msra.mxu1 %v1460_v28 }
  0x1c   :  { %334 = vmatprep.subr.bf16.mxu0 %v1461_v29  ;;  %447 = vmatprep.subr.bf16.mxu1 %v1463_v30 }
  0x1f   :  { %335 = vmatpush1.bf16.msra.mxu0 %v1465_v31  ;;  %448 = vmatpush1.bf16.msra.mxu1 %v1466_v32 }
  0x20   :  { %1287 = vmatprep.subr.bf16.mxu0 %v1475_v34  ;;  %1351 = vmatprep.subr.bf16.mxu1 %v1476_v35 }
  0x22   :  { %353 = vmatmul.mubr.bf16.vlgmr.msra.gmra.mxu0 %v1467_v33  ;;  %466 = vmatmul.mubr.bf16.vlgmr.msra.gmra.mxu1 %v1467_v33 }
  0x23   :  { %362 = vmatprep.mubr.bf16.mxu0 %v1529_v2  ;;  %475 = vmatprep.mubr.bf16.mxu1 %v1529_v2 }
  0x24   :  { %1288 = vmatpush3.bf16.msra.mxu0 %v1477_v36  ;;  %1352 = vmatpush3.bf16.msra.mxu1 %v1478_v37 }
  0x25   :  { %1289 = vmatprep.subr.bf16.mxu0 %v1479_v38  ;;  %1353 = vmatprep.subr.bf16.mxu1 %v1480_v39 }
  0x28   :  { %1290 = vmatpush3.bf16.msra.mxu0 %v1481_v40  ;;  %1354 = vmatpush3.bf16.msra.mxu1 %v1482_v42 }
  0x29   :  { %1291 = vmatprep.subr.bf16.mxu0 %v1483_v43  ;;  %1355 = vmatprep.subr.bf16.mxu1 %v1484_v44 }
  0x2a   :  { %363 = vmatmul.mubr.bf16.gmra.mxu0 %v1468_v41  ;;  %476 = vmatmul.mubr.bf16.gmra.mxu1 %v1468_v41 }
  0x2b   :  { %372 = vmatprep.mubr.bf16.mxu0 %v1529_v2  ;;  %485 = vmatprep.mubr.bf16.mxu1 %v1529_v2 }
  0x2c   :  { %1292 = vmatpush3.bf16.msra.mxu0 %v1485_v45  ;;  %1356 = vmatpush3.bf16.msra.mxu1 %v1486_v46 }
  0x2d   :  { %1293 = vmatprep.subr.bf16.mxu0 %v1487_v47  ;;  %1357 = vmatprep.subr.bf16.mxu1 %v1488_v48 }
  0x30   :  { %1294 = vmatpush3.bf16.msra.mxu0 %v1489_v49  ;;  %1358 = vmatpush3.bf16.msra.mxu1 %v1490_v51 }
  0x31   :  { %1295 = vmatprep.subr.bf16.mxu0 %v1491_v52  ;;  %1359 = vmatprep.subr.bf16.mxu1 %v1492_v53 }
  0x32   :  { %373 = vmatmul.mubr.bf16.gmra.mxu0 %v1469_v50  ;;  %486 = vmatmul.mubr.bf16.gmra.mxu1 %v1469_v50 }
  0x33   :  { %382 = vmatprep.mubr.bf16.mxu0 %v1529_v2  ;;  %495 = vmatprep.mubr.bf16.mxu1 %v1529_v2 }
  0x34   :  { %1296 = vmatpush3.bf16.msra.mxu0 %v1493_v54  ;;  %1360 = vmatpush3.bf16.msra.mxu1 %v1494_v55 }
  0x35   :  { %1297 = vmatprep.subr.bf16.mxu0 %v1495_v56  ;;  %1361 = vmatprep.subr.bf16.mxu1 %v1496_v57 }
  0x38   :  { %1298 = vmatpush3.bf16.msra.mxu0 %v1497_v58  ;;  %1362 = vmatpush3.bf16.msra.mxu1 %v1498_v60 }
  0x39   :  { %1299 = vmatprep.subr.bf16.mxu0 %v1499_v61  ;;  %1363 = vmatprep.subr.bf16.mxu1 %v1500_v62 }
  0x3a   :  { %383 = vmatmul.mubr.bf16.gmra.mxu0 %v1470_v59  ;;  %496 = vmatmul.mubr.bf16.gmra.mxu1 %v1470_v59 }
  0x3b   :  { %392 = vmatprep.mubr.bf16.mxu0 %v1529_v2  ;;  %505 = vmatprep.mubr.bf16.mxu1 %v1529_v2 }
  0x3c   :  { %10 = vsyncpa [#allocation4], 0  ;;  %1300 = vmatpush3.bf16.msra.mxu0 %v1501_v63  ;;  %1364 = vmatpush3.bf16.msra.mxu1 %v1502_v0  ;;  %v1471_v1 = vld [vmem:[%s1894_s0 + $0x20] sm:$0xff]   ;;  %v1472_v3 = vld [vmem:[%s1894_s0 + $0x28] sm:$0xff]   ;;  %v92_v9 = vlaneseq }
  0x3d   :  { %v1473_v4 = vld [vmem:[%s1894_s0 + $0x30] sm:$0xff]   ;;  %v1474_v5 = vld [vmem:[%s1894_s0 + $0x38] sm:$0xff]   ;;  %v1503_v6 = vld [vmem:[%s1897_s3 + $0x40] sm:$0xff]  }
  0x3e   :  { %v1504_v7 = vld [vmem:[%s1897_s3 + $0xc0] sm:$0xff]   ;;  %1301 = vmatprep.subr.bf16.mxu0 %v1503_v6  ;;  %v93_v10 = vshrl.u32 %v92_v9, 7 }
  0x3f   :  { %v1505_v8 = vld [vmem:[%s1897_s3] sm:$0xff]   ;;  %1365 = vmatprep.subr.bf16.mxu1 %v1504_v7 }
  0x40   :  { %1302 = vmatpush3.bf16.msra.mxu0 %v1505_v8  ;;  %v98_v11 = vsub.s32 1, %v93_v10  ;;  %v106_v12 = vsub.s32 3, %v93_v10  ;;  %v94_v13 = vsub.s32 0, %v93_v10  ;;  %v102_v14 = vsub.s32 2, %v93_v10  ;;  %v90_v15 = vld [vmem:[%s1896_s2] sm:$0xf] }
  0x42   :  { %393 = vmatmul.mubr.bf16.gmra.mxu0 %v1471_v1  ;;  %506 = vmatmul.mubr.bf16.gmra.mxu1 %v1471_v1  ;;  %v1798_v18 = vrot.slane %v90_v15, %v98_v11  ;;  %v1800_v19 = vrot.slane %v90_v15, %v106_v12  ;;  %v1802_v20 = vrot.slane %v90_v15, %v94_v13 }
  0x43   :  { %402 = vmatprep.mubr.bf16.mxu0 %v1529_v2  ;;  %515 = vmatprep.mubr.bf16.mxu1 %v1529_v2  ;;  %v1804_v21 = vrot.slane %v90_v15, %v102_v14 }
  0x4a   :  { %403 = vmatmul.mubr.bf16.gmra.mxu0 %v1472_v3  ;;  %516 = vmatmul.mubr.bf16.gmra.mxu1 %v1472_v3 }
  0x4b   :  { %412 = vmatprep.mubr.bf16.mxu0 %v1529_v2  ;;  %525 = vmatprep.mubr.bf16.mxu1 %v1529_v2 }
  0x52   :  { %413 = vmatmul.mubr.bf16.gmra.mxu0 %v1473_v4  ;;  %526 = vmatmul.mubr.bf16.gmra.mxu1 %v1473_v4 }
  0x53   :  { %422 = vmatprep.mubr.bf16.mxu0 %v1529_v2  ;;  %535 = vmatprep.mubr.bf16.mxu1 %v1529_v2  ;;  %v1506_v2 = vld [vmem:[%s1897_s3 + $0x80] sm:$0xff]  }
  0x54   :  { %1366 = vmatpush3.bf16.msra.mxu1 %v1506_v2 }
  0x5a   :  { %423 = vmatmul.mubr.bf16.gmra.mxu0 %v1474_v5  ;;  %536 = vmatmul.mubr.bf16.gmra.mxu1 %v1474_v5 }
  0xe2   :  { %v354_v16 = vpop.f32.mrf.mxu0  ;;  %v467_v17 = vpop.f32.mrf.mxu1 }
  0xe3   :  { %v355_v30 = vadd.f32 %v354_v16, %v1802_v20  ;;  %v468_v31 = vadd.f32 %v467_v17, %v1804_v21 }
  0xe4   :  { %v356_v22 = vpop.f32.mrf.mxu0  ;;  %v469_v23 = vpop.f32.mrf.mxu1 }
  0xe5   :  { %v357_v26 = vadd.f32 %v356_v22, %v1798_v18  ;;  %v470_v27 = vadd.f32 %v469_v23, %v1800_v19  ;;  %v546_v44 = vmax.f32 %v355_v30, 0.0  ;;  %v548_v45 = vmax.f32 %v468_v31, 0.0 }
  0xe6   :  { %v358_v24 = vpop.f32.mrf.mxu0  ;;  %v471_v25 = vpop.f32.mrf.mxu1 }
  0xe7   :  { %v359_v28 = vadd.f32 %v358_v24, %v1802_v20  ;;  %v472_v29 = vadd.f32 %v471_v25, %v1804_v21  ;;  %v547_v40 = vmax.f32 %v357_v26, 0.0  ;;  %v549_v41 = vmax.f32 %v470_v27, 0.0 }
  0xe8   :  { %v360_v32 = vpop.f32.mrf.mxu0  ;;  %v473_v33 = vpop.f32.mrf.mxu1 }
  0xe9   :  { %v361_v34 = vadd.f32 %v360_v32, %v1798_v18  ;;  %v474_v35 = vadd.f32 %v473_v33, %v1800_v19  ;;  %v550_v36 = vmax.f32 %v359_v28, 0.0  ;;  %v552_v37 = vmax.f32 %v472_v29, 0.0 }
  0xea   :  { %v364_v38 = vpop.f32.mrf.mxu0  ;;  %v477_v39 = vpop.f32.mrf.mxu1 }
  0xeb   :  { %v551_v42 = vmax.f32 %v361_v34, 0.0  ;;  %v553_v43 = vmax.f32 %v474_v35, 0.0  ;;  %v626_v50 = vpack.c.bf16 %v550_v36, %v546_v44  ;;  %v628_v51 = vpack.c.bf16 %v552_v37, %v548_v45 }
  0xec   :  { %v366_v46 = vpop.f32.mrf.mxu0  ;;  %v479_v47 = vpop.f32.mrf.mxu1  ;;  %v365_v58 = vadd.f32 %v364_v38, %v1802_v20  ;;  %v478_v59 = vadd.f32 %v477_v39, %v1804_v21 }
  0xed   :  { %v627_v48 = vpack.c.bf16 %v551_v42, %v547_v40  ;;  %v629_v49 = vpack.c.bf16 %v553_v43, %v549_v41  ;;  %v367_v52 = vadd.f32 %v366_v46, %v1798_v18  ;;  %v480_v55 = vadd.f32 %v479_v47, %v1800_v19 }
  0xee   :  { %v368_v53 = vpop.f32.mrf.mxu0  ;;  %v481_v54 = vpop.f32.mrf.mxu1  ;;  %v554_v2 = vmax.f32 %v365_v58, 0.0  ;;  %v556_v9 = vmax.f32 %v478_v59, 0.0 }
  0xef   :  { %v369_v56 = vadd.f32 %v368_v53, %v1802_v20  ;;  %v482_v57 = vadd.f32 %v481_v54, %v1804_v21  ;;  %946 = vmatprep.mubr.bf16.mxu0 %v627_v48  ;;  %1043 = vmatprep.mubr.bf16.mxu1 %v629_v49  ;;  %v555_v5 = vmax.f32 %v367_v52, 0.0  ;;  %v557_v6 = vmax.f32 %v480_v55, 0.0 }
  0xf0   :  { %v370_v60 = vpop.f32.mrf.mxu0  ;;  %v483_v61 = vpop.f32.mrf.mxu1  ;;  %947 = vmatmul.mubr.bf16.vlgmr.msra.gmra.mxu0 %v626_v50  ;;  %1044 = vmatmul.mubr.bf16.vlgmr.msra.gmra.mxu1 %v628_v51 }
  0xf1   :  { %v371_v62 = vadd.f32 %v370_v60, %v1798_v18  ;;  %v484_v63 = vadd.f32 %v483_v61, %v1800_v19  ;;  %v558_v0 = vmax.f32 %v369_v56, 0.0  ;;  %v560_v1 = vmax.f32 %v482_v57, 0.0 }
  0xf2   :  { %v374_v3 = vpop.f32.mrf.mxu0  ;;  %v487_v4 = vpop.f32.mrf.mxu1 }
  0xf3   :  { %v559_v7 = vmax.f32 %v371_v62, 0.0  ;;  %v561_v8 = vmax.f32 %v484_v63, 0.0  ;;  %v630_v14 = vpack.c.bf16 %v558_v0, %v554_v2  ;;  %v632_v15 = vpack.c.bf16 %v560_v1, %v556_v9 }
  0xf4   :  { %v376_v10 = vpop.f32.mrf.mxu0  ;;  %v489_v11 = vpop.f32.mrf.mxu1  ;;  %v375_v26 = vadd.f32 %v374_v3, %v1802_v20  ;;  %v488_v27 = vadd.f32 %v487_v4, %v1804_v21 }
  0xf5   :  { %v631_v12 = vpack.c.bf16 %v559_v7, %v555_v5  ;;  %v633_v13 = vpack.c.bf16 %v561_v8, %v557_v6  ;;  %v377_v16 = vadd.f32 %v376_v10, %v1798_v18  ;;  %v490_v23 = vadd.f32 %v489_v11, %v1800_v19 }
  0xf6   :  { %v378_v17 = vpop.f32.mrf.mxu0  ;;  %v491_v22 = vpop.f32.mrf.mxu1  ;;  %v562_v40 = vmax.f32 %v375_v26, 0.0  ;;  %v564_v41 = vmax.f32 %v488_v27, 0.0 }
  0xf7   :  { %v379_v24 = vadd.f32 %v378_v17, %v1802_v20  ;;  %v492_v25 = vadd.f32 %v491_v22, %v1804_v21  ;;  %954 = vmatprep.mubr.bf16.mxu0 %v631_v12  ;;  %1051 = vmatprep.mubr.bf16.mxu1 %v633_v13  ;;  %v563_v36 = vmax.f32 %v377_v16, 0.0  ;;  %v565_v37 = vmax.f32 %v490_v23, 0.0 }
  0xf8   :  { %v380_v28 = vpop.f32.mrf.mxu0  ;;  %v493_v29 = vpop.f32.mrf.mxu1  ;;  %955 = vmatmul.mubr.bf16.gmra.mxu0 %v630_v14  ;;  %1052 = vmatmul.mubr.bf16.gmra.mxu1 %v632_v15 }
  0xf9   :  { %v381_v30 = vadd.f32 %v380_v28, %v1798_v18  ;;  %v494_v31 = vadd.f32 %v493_v29, %v1800_v19  ;;  %v566_v32 = vmax.f32 %v379_v24, 0.0  ;;  %v568_v33 = vmax.f32 %v492_v25, 0.0 }
  0xfa   :  { %v384_v34 = vpop.f32.mrf.mxu0  ;;  %v497_v35 = vpop.f32.mrf.mxu1 }
  0xfb   :  { %v567_v38 = vmax.f32 %v381_v30, 0.0  ;;  %v569_v39 = vmax.f32 %v494_v31, 0.0  ;;  %v634_v46 = vpack.c.bf16 %v566_v32, %v562_v40  ;;  %v636_v47 = vpack.c.bf16 %v568_v33, %v564_v41 }
  0xfc   :  { %v386_v42 = vpop.f32.mrf.mxu0  ;;  %v499_v43 = vpop.f32.mrf.mxu1  ;;  %v385_v54 = vadd.f32 %v384_v34, %v1802_v20  ;;  %v498_v55 = vadd.f32 %v497_v35, %v1804_v21 }
  0xfd   :  { %v635_v44 = vpack.c.bf16 %v567_v38, %v563_v36  ;;  %v637_v45 = vpack.c.bf16 %v569_v39, %v565_v37  ;;  %v387_v48 = vadd.f32 %v386_v42, %v1798_v18  ;;  %v500_v51 = vadd.f32 %v499_v43, %v1800_v19 }
  0xfe   :  { %v388_v49 = vpop.f32.mrf.mxu0  ;;  %v501_v50 = vpop.f32.mrf.mxu1  ;;  %v570_v5 = vmax.f32 %v385_v54, 0.0  ;;  %v572_v6 = vmax.f32 %v498_v55, 0.0 }
  0xff   :  { %v389_v52 = vadd.f32 %v388_v49, %v1802_v20  ;;  %v502_v53 = vadd.f32 %v501_v50, %v1804_v21  ;;  %962 = vmatprep.mubr.bf16.mxu0 %v635_v44  ;;  %1059 = vmatprep.mubr.bf16.mxu1 %v637_v45  ;;  %v571_v0 = vmax.f32 %v387_v48, 0.0  ;;  %v573_v1 = vmax.f32 %v500_v51, 0.0 }
 0x100   :  { %v390_v56 = vpop.f32.mrf.mxu0  ;;  %v503_v57 = vpop.f32.mrf.mxu1  ;;  %963 = vmatmul.mubr.bf16.gmra.mxu0 %v634_v46  ;;  %1060 = vmatmul.mubr.bf16.gmra.mxu1 %v636_v47 }
 0x101   :  { %v391_v58 = vadd.f32 %v390_v56, %v1798_v18  ;;  %v504_v59 = vadd.f32 %v503_v57, %v1800_v19  ;;  %v574_v60 = vmax.f32 %v389_v52, 0.0  ;;  %v576_v61 = vmax.f32 %v502_v53, 0.0 }
 0x102   :  { %v394_v62 = vpop.f32.mrf.mxu0  ;;  %v507_v63 = vpop.f32.mrf.mxu1 }
 0x103   :  { %v575_v3 = vmax.f32 %v391_v58, 0.0  ;;  %v577_v4 = vmax.f32 %v504_v59, 0.0  ;;  %v638_v10 = vpack.c.bf16 %v574_v60, %v570_v5  ;;  %v640_v11 = vpack.c.bf16 %v576_v61, %v572_v6 }
 0x104   :  { %v396_v7 = vpop.f32.mrf.mxu0  ;;  %v509_v8 = vpop.f32.mrf.mxu1  ;;  %v395_v22 = vadd.f32 %v394_v62, %v1802_v20  ;;  %v508_v23 = vadd.f32 %v507_v63, %v1804_v21 }
 0x105   :  { %v639_v2 = vpack.c.bf16 %v575_v3, %v571_v0  ;;  %v641_v9 = vpack.c.bf16 %v577_v4, %v573_v1  ;;  %v397_v12 = vadd.f32 %v396_v7, %v1798_v18  ;;  %v510_v15 = vadd.f32 %v509_v8, %v1800_v19 }
 0x106   :  { %v398_v13 = vpop.f32.mrf.mxu0  ;;  %v511_v14 = vpop.f32.mrf.mxu1  ;;  %v578_v36 = vmax.f32 %v395_v22, 0.0  ;;  %v580_v37 = vmax.f32 %v508_v23, 0.0 }
 0x107   :  { %v399_v16 = vadd.f32 %v398_v13, %v1802_v20  ;;  %v512_v17 = vadd.f32 %v511_v14, %v1804_v21  ;;  %970 = vmatprep.mubr.bf16.mxu0 %v639_v2  ;;  %1067 = vmatprep.mubr.bf16.mxu1 %v641_v9  ;;  %v579_v32 = vmax.f32 %v397_v12, 0.0  ;;  %v581_v33 = vmax.f32 %v510_v15, 0.0 }
 0x108   :  { %v400_v24 = vpop.f32.mrf.mxu0  ;;  %v513_v25 = vpop.f32.mrf.mxu1  ;;  %971 = vmatmul.mubr.bf16.gmra.mxu0 %v638_v10  ;;  %1068 = vmatmul.mubr.bf16.gmra.mxu1 %v640_v11 }
 0x109   :  { %v401_v26 = vadd.f32 %v400_v24, %v1798_v18  ;;  %v514_v27 = vadd.f32 %v513_v25, %v1800_v19  ;;  %v582_v28 = vmax.f32 %v399_v16, 0.0  ;;  %v584_v29 = vmax.f32 %v512_v17, 0.0 }
 0x10a   :  { %v404_v30 = vpop.f32.mrf.mxu0  ;;  %v517_v31 = vpop.f32.mrf.mxu1 }
 0x10b   :  { %v583_v34 = vmax.f32 %v401_v26, 0.0  ;;  %v585_v35 = vmax.f32 %v514_v27, 0.0  ;;  %v642_v42 = vpack.c.bf16 %v582_v28, %v578_v36  ;;  %v644_v43 = vpack.c.bf16 %v584_v29, %v580_v37 }
 0x10c   :  { %v406_v38 = vpop.f32.mrf.mxu0  ;;  %v519_v39 = vpop.f32.mrf.mxu1  ;;  %v405_v50 = vadd.f32 %v404_v30, %v1802_v20  ;;  %v518_v51 = vadd.f32 %v517_v31, %v1804_v21 }
 0x10d   :  { %v643_v40 = vpack.c.bf16 %v583_v34, %v579_v32  ;;  %v645_v41 = vpack.c.bf16 %v585_v35, %v581_v33  ;;  %v407_v44 = vadd.f32 %v406_v38, %v1798_v18  ;;  %v520_v47 = vadd.f32 %v519_v39, %v1800_v19 }
 0x10e   :  { %v408_v45 = vpop.f32.mrf.mxu0  ;;  %v521_v46 = vpop.f32.mrf.mxu1  ;;  %v586_v0 = vmax.f32 %v405_v50, 0.0  ;;  %v588_v1 = vmax.f32 %v518_v51, 0.0 }
 0x10f   :  { %v409_v48 = vadd.f32 %v408_v45, %v1802_v20  ;;  %v522_v49 = vadd.f32 %v521_v46, %v1804_v21  ;;  %978 = vmatprep.mubr.bf16.mxu0 %v643_v40  ;;  %1075 = vmatprep.mubr.bf16.mxu1 %v645_v41  ;;  %v587_v60 = vmax.f32 %v407_v44, 0.0  ;;  %v589_v61 = vmax.f32 %v520_v47, 0.0 }
 0x110   :  { %v410_v52 = vpop.f32.mrf.mxu0  ;;  %v523_v53 = vpop.f32.mrf.mxu1  ;;  %979 = vmatmul.mubr.bf16.gmra.mxu0 %v642_v42  ;;  %1076 = vmatmul.mubr.bf16.gmra.mxu1 %v644_v43 }
 0x111   :  { %v411_v54 = vadd.f32 %v410_v52, %v1798_v18  ;;  %v524_v55 = vadd.f32 %v523_v53, %v1800_v19  ;;  %v590_v56 = vmax.f32 %v409_v48, 0.0  ;;  %v592_v57 = vmax.f32 %v522_v49, 0.0 }
 0x112   :  { %v414_v58 = vpop.f32.mrf.mxu0  ;;  %v527_v59 = vpop.f32.mrf.mxu1 }
 0x113   :  { %v591_v62 = vmax.f32 %v411_v54, 0.0  ;;  %v593_v63 = vmax.f32 %v524_v55, 0.0  ;;  %v646_v7 = vpack.c.bf16 %v590_v56, %v586_v0  ;;  %v648_v8 = vpack.c.bf16 %v592_v57, %v588_v1 }
 0x114   :  { %v416_v3 = vpop.f32.mrf.mxu0  ;;  %v529_v4 = vpop.f32.mrf.mxu1  ;;  %v415_v14 = vadd.f32 %v414_v58, %v1802_v20  ;;  %v528_v15 = vadd.f32 %v527_v59, %v1804_v21 }
 0x115   :  { %v647_v5 = vpack.c.bf16 %v591_v62, %v587_v60  ;;  %v649_v6 = vpack.c.bf16 %v593_v63, %v589_v61  ;;  %v417_v2 = vadd.f32 %v416_v3, %v1798_v18  ;;  %v530_v11 = vadd.f32 %v529_v4, %v1800_v19  ;;  %v1873_v3 = vld [vmem:[%s1898_s4] ss:$0 sm:$0xff]  ;;  %s1530_s4 = smov [#allocation3]  }
 0x116   :  { %v418_v9 = vpop.f32.mrf.mxu0  ;;  %v531_v10 = vpop.f32.mrf.mxu1  ;;  %v594_v32 = vmax.f32 %v415_v14, 0.0  ;;  %v596_v33 = vmax.f32 %v528_v15, 0.0  ;;  %s1203_s10 = sshll.u32 %s1530_s4, 4  ;;  %s1204_s10 = int_to_ptr.vmem [resolvable:$true] %s1203_s10 }
 0x117   :  { %v419_v12 = vadd.f32 %v418_v9, %v1802_v20  ;;  %v532_v13 = vadd.f32 %v531_v10, %v1804_v21  ;;  %986 = vmatprep.mubr.bf16.mxu0 %v647_v5  ;;  %1083 = vmatprep.mubr.bf16.mxu1 %v649_v6  ;;  %v595_v28 = vmax.f32 %v417_v2, 0.0  ;;  %v597_v29 = vmax.f32 %v530_v11, 0.0  ;;  %s1507_s11 = scalar_lea.vmem %s1204_s10, 2048  ;;  %p1512_p1 = scmp.lt.s32.totalorder %s1204_s10, %s1204_s10 }
 0x118   :  { %v420_v16 = vpop.f32.mrf.mxu0  ;;  %v533_v17 = vpop.f32.mrf.mxu1  ;;  %987 = vmatmul.mubr.bf16.gmra.mxu0 %v646_v7  ;;  %1084 = vmatmul.mubr.bf16.gmra.mxu1 %v648_v8  ;;  %p1508_p0 = scmp.ne.s32.totalorder %s1204_s10, %s1507_s11  ;;  %p1513_p2 = scmp.lt.s32.totalorder %s1507_s11, %s1507_s11 }
 0x119   :  { %v421_v22 = vadd.f32 %v420_v16, %v1798_v18  ;;  %v534_v23 = vadd.f32 %v533_v17, %v1800_v19  ;;  %v598_v24 = vmax.f32 %v419_v12, 0.0  ;;  %v600_v25 = vmax.f32 %v532_v13, 0.0 }
 0x11a   :  { %v424_v26 = vpop.f32.mrf.mxu0  ;;  %v537_v27 = vpop.f32.mrf.mxu1  ;;  %p1514_p3 = por %p1513_p2, %p1512_p1 }
 0x11b   :  { %v599_v30 = vmax.f32 %v421_v22, 0.0  ;;  %v601_v31 = vmax.f32 %v534_v23, 0.0  ;;  %v650_v38 = vpack.c.bf16 %v598_v24, %v594_v32  ;;  %v652_v39 = vpack.c.bf16 %v600_v25, %v596_v33 }
 0x11c   :  { %v426_v34 = vpop.f32.mrf.mxu0  ;;  %v539_v35 = vpop.f32.mrf.mxu1  ;;  %v425_v46 = vadd.f32 %v424_v26, %v1802_v20  ;;  %v538_v47 = vadd.f32 %v537_v27, %v1804_v21  ;;  %p1515_p4 = pnand %p1514_p3, %p1508_p0 }
 0x11d   :  { %v651_v36 = vpack.c.bf16 %v599_v30, %v595_v28  ;;  %v653_v37 = vpack.c.bf16 %v601_v31, %v597_v29  ;;  %v427_v40 = vadd.f32 %v426_v34, %v1798_v18  ;;  %v540_v43 = vadd.f32 %v539_v35, %v1800_v19 }
 0x11e   :  { %v428_v41 = vpop.f32.mrf.mxu0  ;;  %v541_v42 = vpop.f32.mrf.mxu1  ;;  %v602_v58 = vmax.f32 %v425_v46, 0.0  ;;  %v604_v59 = vmax.f32 %v538_v47, 0.0 }
 0x11f   :  { %v429_v44 = vadd.f32 %v428_v41, %v1802_v20  ;;  %v542_v45 = vadd.f32 %v541_v42, %v1804_v21  ;;  %994 = vmatprep.mubr.bf16.mxu0 %v651_v36  ;;  %1091 = vmatprep.mubr.bf16.mxu1 %v653_v37  ;;  %v603_v54 = vmax.f32 %v427_v40, 0.0  ;;  %v605_v55 = vmax.f32 %v540_v43, 0.0 }
 0x120   :  { %v430_v48 = vpop.f32.mrf.mxu0  ;;  %v543_v49 = vpop.f32.mrf.mxu1  ;;  %995 = vmatmul.mubr.bf16.gmra.mxu0 %v650_v38  ;;  %1092 = vmatmul.mubr.bf16.gmra.mxu1 %v652_v39 }
 0x121   :  { %v431_v50 = vadd.f32 %v430_v48, %v1798_v18  ;;  %v544_v51 = vadd.f32 %v543_v49, %v1800_v19  ;;  %v606_v52 = vmax.f32 %v429_v44, 0.0  ;;  %v608_v53 = vmax.f32 %v542_v45, 0.0 }
 0x123   :  { %v607_v56 = vmax.f32 %v431_v50, 0.0  ;;  %v609_v57 = vmax.f32 %v544_v51, 0.0  ;;  %v654_v61 = vpack.c.bf16 %v606_v52, %v602_v58  ;;  %v656_v21 = vpack.c.bf16 %v608_v53, %v604_v59 }
 0x125   :  { %v655_v60 = vpack.c.bf16 %v607_v56, %v603_v54  ;;  %v657_v20 = vpack.c.bf16 %v609_v57, %v605_v55 }
 0x127   :  { %1002 = vmatprep.mubr.bf16.mxu0 %v655_v60  ;;  %1099 = vmatprep.mubr.bf16.mxu1 %v657_v20 }
 0x128   :  { %1003 = vmatmul.mubr.bf16.gmra.mxu0 %v654_v61  ;;  %1100 = vmatmul.mubr.bf16.gmra.mxu1 %v656_v21 }
 0x1b0   :  { %v1303_v62 = vpop.f32.mrf.mxu0  ;;  %v1367_v18 = vpop.f32.mrf.mxu1 }
 0x1b2   :  { %v1304_v63 = vpop.f32.mrf.mxu0  ;;  %v1368_v19 = vpop.f32.mrf.mxu1 }
 0x1b3   :  { %v1305_v0 = vadd.f32 %v1304_v63, %v1303_v62  ;;  %v1369_v1 = vadd.f32 %v1368_v19, %v1367_v18 }
 0x1b4   :  { %v1306_v4 = vpop.f32.mrf.mxu0  ;;  %v1370_v5 = vpop.f32.mrf.mxu1 }
 0x1b5   :  { %v1046_v6 = vadd.f32 %v1369_v1, %v1305_v0 }
 0x1b6   :  { %v1307_v7 = vpop.f32.mrf.mxu0  ;;  %v1371_v8 = vpop.f32.mrf.mxu1 }
 0x1b7   :  { %v1166_v2 = vadd.f32 %v1873_v3, %v1046_v6  ;;  %v1308_v9 = vadd.f32 %v1307_v7, %v1306_v4  ;;  %v1372_v10 = vadd.f32 %v1371_v8, %v1370_v5 }
 0x1b8   :  { %v1309_v11 = vpop.f32.mrf.mxu0  ;;  %v1373_v12 = vpop.f32.mrf.mxu1 }
 0x1b9   :  { %1182 = vst [vmem:[#allocation3] sm:$0xff] %v1166_v2  ;;  %v1049_v13 = vadd.f32 %v1372_v10, %v1308_v9 }
 0x1ba   :  { %v1310_v14 = vpop.f32.mrf.mxu0  ;;  %v1374_v15 = vpop.f32.mrf.mxu1 }
 0x1bb   :  { %v1167_v16 = vadd.f32 %v1873_v3, %v1049_v13  ;;  %v1311_v17 = vadd.f32 %v1310_v14, %v1309_v11  ;;  %v1375_v22 = vadd.f32 %v1374_v15, %v1373_v12 }
 0x1bc   :  { %v1312_v23 = vpop.f32.mrf.mxu0  ;;  %v1376_v24 = vpop.f32.mrf.mxu1 }
 0x1bd   :  { %1183 = vst [vmem:[#allocation3 + $0x8] sm:$0xff] %v1167_v16  ;;  %v1054_v25 = vadd.f32 %v1375_v22, %v1311_v17 }
 0x1be   :  { %v1313_v26 = vpop.f32.mrf.mxu0  ;;  %v1377_v27 = vpop.f32.mrf.mxu1 }
 0x1bf   :  { %v1168_v28 = vadd.f32 %v1873_v3, %v1054_v25  ;;  %v1314_v29 = vadd.f32 %v1313_v26, %v1312_v23  ;;  %v1378_v30 = vadd.f32 %v1377_v27, %v1376_v24 }
 0x1c0   :  { %v1315_v31 = vpop.f32.mrf.mxu0  ;;  %v1379_v32 = vpop.f32.mrf.mxu1 }
 0x1c1   :  { %1184 = vst [vmem:[#allocation3 + $0x10] sm:$0xff] %v1168_v28  ;;  %v1057_v33 = vadd.f32 %v1378_v30, %v1314_v29 }
 0x1c2   :  { %v1316_v34 = vpop.f32.mrf.mxu0  ;;  %v1380_v35 = vpop.f32.mrf.mxu1 }
 0x1c3   :  { %v1169_v36 = vadd.f32 %v1873_v3, %v1057_v33  ;;  %v1317_v37 = vadd.f32 %v1316_v34, %v1315_v31  ;;  %v1381_v38 = vadd.f32 %v1380_v35, %v1379_v32 }
 0x1c4   :  { %v1318_v39 = vpop.f32.mrf.mxu0  ;;  %v1382_v40 = vpop.f32.mrf.mxu1 }
 0x1c5   :  { %1185 = vst [vmem:[#allocation3 + $0x18] sm:$0xff] %v1169_v36  ;;  %v1062_v41 = vadd.f32 %v1381_v38, %v1317_v37 }
 0x1c6   :  { %v1319_v42 = vpop.f32.mrf.mxu0  ;;  %v1383_v43 = vpop.f32.mrf.mxu1 }
 0x1c7   :  { %v1170_v44 = vadd.f32 %v1873_v3, %v1062_v41  ;;  %v1320_v45 = vadd.f32 %v1319_v42, %v1318_v39  ;;  %v1384_v46 = vadd.f32 %v1383_v43, %v1382_v40 }
 0x1c8   :  { %v1321_v47 = vpop.f32.mrf.mxu0  ;;  %v1385_v48 = vpop.f32.mrf.mxu1 }
 0x1c9   :  { %1186 = vst [vmem:[#allocation3 + $0x20] sm:$0xff] %v1170_v44  ;;  %v1065_v49 = vadd.f32 %v1384_v46, %v1320_v45 }
 0x1ca   :  { %v1322_v50 = vpop.f32.mrf.mxu0  ;;  %v1386_v51 = vpop.f32.mrf.mxu1 }
 0x1cb   :  { %v1171_v52 = vadd.f32 %v1873_v3, %v1065_v49  ;;  %v1323_v53 = vadd.f32 %v1322_v50, %v1321_v47  ;;  %v1387_v54 = vadd.f32 %v1386_v51, %v1385_v48 }
 0x1cc   :  { %v1324_v55 = vpop.f32.mrf.mxu0  ;;  %v1388_v56 = vpop.f32.mrf.mxu1 }
 0x1cd   :  { %1187 = vst [vmem:[#allocation3 + $0x28] sm:$0xff] %v1171_v52  ;;  %v1070_v57 = vadd.f32 %v1387_v54, %v1323_v53 }
 0x1ce   :  { %v1325_v58 = vpop.f32.mrf.mxu0  ;;  %v1389_v59 = vpop.f32.mrf.mxu1 }
 0x1cf   :  { %v1172_v60 = vadd.f32 %v1873_v3, %v1070_v57  ;;  %v1326_v20 = vadd.f32 %v1325_v58, %v1324_v55  ;;  %v1390_v61 = vadd.f32 %v1389_v59, %v1388_v56 }
 0x1d0   :  { %v1327_v21 = vpop.f32.mrf.mxu0  ;;  %v1391_v62 = vpop.f32.mrf.mxu1 }
 0x1d1   :  { %1188 = vst [vmem:[#allocation3 + $0x30] sm:$0xff] %v1172_v60  ;;  %v1073_v18 = vadd.f32 %v1390_v61, %v1326_v20 }
 0x1d2   :  { %v1328_v63 = vpop.f32.mrf.mxu0  ;;  %v1392_v19 = vpop.f32.mrf.mxu1 }
 0x1d3   :  { %v1173_v0 = vadd.f32 %v1873_v3, %v1073_v18  ;;  %v1329_v1 = vadd.f32 %v1328_v63, %v1327_v21  ;;  %v1393_v4 = vadd.f32 %v1392_v19, %v1391_v62 }
 0x1d4   :  { %v1330_v5 = vpop.f32.mrf.mxu0  ;;  %v1394_v6 = vpop.f32.mrf.mxu1 }
 0x1d5   :  { %1189 = vst [vmem:[#allocation3 + $0x38] sm:$0xff] %v1173_v0  ;;  %v1078_v7 = vadd.f32 %v1393_v4, %v1329_v1 }
 0x1d6   :  { %v1331_v8 = vpop.f32.mrf.mxu0  ;;  %v1395_v2 = vpop.f32.mrf.mxu1 }
 0x1d7   :  { %v1174_v9 = vadd.f32 %v1873_v3, %v1078_v7  ;;  %v1332_v10 = vadd.f32 %v1331_v8, %v1330_v5  ;;  %v1396_v11 = vadd.f32 %v1395_v2, %v1394_v6 }
 0x1d8   :  { %v1333_v12 = vpop.f32.mrf.mxu0  ;;  %v1397_v13 = vpop.f32.mrf.mxu1 }
 0x1d9   :  { %1190 = vst [vmem:[#allocation3 + $0x40] sm:$0xff] %v1174_v9  ;;  %v1081_v14 = vadd.f32 %v1396_v11, %v1332_v10 }
 0x1da   :  { %v1334_v15 = vpop.f32.mrf.mxu0  ;;  %v1398_v16 = vpop.f32.mrf.mxu1 }
 0x1db   :  { %v1175_v17 = vadd.f32 %v1873_v3, %v1081_v14  ;;  %v1335_v22 = vadd.f32 %v1334_v15, %v1333_v12  ;;  %v1399_v23 = vadd.f32 %v1398_v16, %v1397_v13 }
 0x1dc   :  { %v1336_v24 = vpop.f32.mrf.mxu0  ;;  %v1400_v25 = vpop.f32.mrf.mxu1 }
 0x1dd   :  { %1191 = vst [vmem:[#allocation3 + $0x48] sm:$0xff] %v1175_v17  ;;  %v1086_v26 = vadd.f32 %v1399_v23, %v1335_v22 }
 0x1de   :  { %v1337_v27 = vpop.f32.mrf.mxu0  ;;  %v1401_v28 = vpop.f32.mrf.mxu1 }
 0x1df   :  { %v1176_v29 = vadd.f32 %v1873_v3, %v1086_v26  ;;  %v1338_v30 = vadd.f32 %v1337_v27, %v1336_v24  ;;  %v1402_v31 = vadd.f32 %v1401_v28, %v1400_v25 }
 0x1e0   :  { %v1339_v32 = vpop.f32.mrf.mxu0  ;;  %v1403_v33 = vpop.f32.mrf.mxu1 }
 0x1e1   :  { %1192 = vst [vmem:[#allocation3 + $0x50] sm:$0xff] %v1176_v29  ;;  %v1089_v34 = vadd.f32 %v1402_v31, %v1338_v30 }
 0x1e2   :  { %v1340_v35 = vpop.f32.mrf.mxu0  ;;  %v1404_v36 = vpop.f32.mrf.mxu1 }
 0x1e3   :  { %v1177_v37 = vadd.f32 %v1873_v3, %v1089_v34  ;;  %v1341_v38 = vadd.f32 %v1340_v35, %v1339_v32  ;;  %v1405_v39 = vadd.f32 %v1404_v36, %v1403_v33 }
 0x1e4   :  { %v1342_v40 = vpop.f32.mrf.mxu0  ;;  %v1406_v41 = vpop.f32.mrf.mxu1 }
 0x1e5   :  { %1193 = vst [vmem:[#allocation3 + $0x58] sm:$0xff] %v1177_v37  ;;  %v1094_v42 = vadd.f32 %v1405_v39, %v1341_v38 }
 0x1e6   :  { %v1343_v43 = vpop.f32.mrf.mxu0  ;;  %v1407_v44 = vpop.f32.mrf.mxu1 }
 0x1e7   :  { %v1178_v45 = vadd.f32 %v1873_v3, %v1094_v42  ;;  %v1344_v46 = vadd.f32 %v1343_v43, %v1342_v40  ;;  %v1408_v47 = vadd.f32 %v1407_v44, %v1406_v41 }
 0x1e8   :  { %v1345_v48 = vpop.f32.mrf.mxu0  ;;  %v1409_v49 = vpop.f32.mrf.mxu1 }
 0x1e9   :  { %1194 = vst [vmem:[#allocation3 + $0x60] sm:$0xff] %v1178_v45  ;;  %v1097_v50 = vadd.f32 %v1408_v47, %v1344_v46 }
 0x1ea   :  { %v1346_v51 = vpop.f32.mrf.mxu0  ;;  %v1410_v52 = vpop.f32.mrf.mxu1 }
 0x1eb   :  { %v1179_v53 = vadd.f32 %v1873_v3, %v1097_v50  ;;  %v1347_v54 = vadd.f32 %v1346_v51, %v1345_v48  ;;  %v1411_v55 = vadd.f32 %v1410_v52, %v1409_v49 }
 0x1ec   :  { %v1348_v56 = vpop.f32.mrf.mxu0  ;;  %v1412_v57 = vpop.f32.mrf.mxu1 }
 0x1ed   :  { %1195 = vst [vmem:[#allocation3 + $0x68] sm:$0xff] %v1179_v53  ;;  %v1102_v58 = vadd.f32 %v1411_v55, %v1347_v54 }
 0x1ee   :  { %v1349_v59 = vpop.f32.mrf.mxu0  ;;  %v1413_v60 = vpop.f32.mrf.mxu1 }
 0x1ef   :  { %v1180_v20 = vadd.f32 %v1873_v3, %v1102_v58  ;;  %v1350_v61 = vadd.f32 %v1349_v59, %v1348_v56  ;;  %v1414_v21 = vadd.f32 %v1413_v60, %v1412_v57 }
 0x1f1   :  { %1196 = vst [vmem:[#allocation3 + $0x70] sm:$0xff] %v1180_v20  ;;  %v1105_v62 = vadd.f32 %v1414_v21, %v1350_v61 }
 0x1f3   :  { %v1181_v18 = vadd.f32 %v1873_v3, %v1105_v62 }
 0x1f5   :  { %1197 = vst [vmem:[#allocation3 + $0x78] sm:$0xff] %v1181_v18 }
 0x1f6   :  { %1518 = shalt.err (!%p1515_p4)
}
 0x1f7   :  { %s1531_s12 = smov 128   ;;  %s1532_s13 = smov 8  }
 0x1f8   :  { %1209 = dma.vmem_to_hbm [thread:$0]  %s1204_s10, 2048, %s1899_s5, [#allocation4], %s1531_s12, %s1531_s12, %s1532_s13  }
 0x1f9   :  { %1527 = dma.done.wait [#allocation4], 2048  }
 0x1fa   :  { %1528 = vsyncadd [#allocation4], 4294965248 }
 0x1fb   :  { %1213 = vsyncpa [#allocation4], 1 }

</bundles_post_ra>
